<compile_context>
chip_gen: v7x
topology: tpu7x:2x2x1
jax: 0.10.0
libtpu: 0.0.40
codegen_flags: <defaults>
</compile_context>

<pallas_src>
import math

import jax
import jax.numpy as jnp
from jax import lax
from jax.experimental import pallas as pl
from jax.experimental.pallas import tpu as pltpu

_F32_EPS = 1.1920928955078125e-07  # torch.finfo(torch.float32).eps (F.rms_norm default)


def _round_up(x, m):
    return ((x + m - 1) // m) * m


def _pick_tile(dim, candidates=(512, 256, 128)):
    for c in candidates:
        if dim % c == 0:
            return c
    return dim  # full-dim block is always a legal block shape


# ----------------------------------------------------------------------------
# Linear:  y = x @ W^T + b, with W stored torch-style as (out_features, in_features)
# ----------------------------------------------------------------------------
def _linear_kernel(x_ref, w_ref, b_ref, o_ref, acc_ref):
    k = pl.program_id(2)

    @pl.when(k == 0)
    def _():
        acc_ref[...] = jnp.zeros_like(acc_ref)

    # Contract x (tm, tk) against torch-layout w (tn, tk) directly: the MXU handles
    # the transposed contraction natively, so no w.T materialization in HBM.
    # TODO(synk): optionally cast operands to bf16 (f32 accumulate) on v6e for more
    # MXU throughput; kept f32 here to match the f32 PyTorch reference numerics.
    acc_ref[...] += lax.dot_general(
        x_ref[...], w_ref[...],
        dimension_numbers=(((1,), (1,)), ((), ())),
        preferred_element_type=jnp.float32)

    @pl.when(k == pl.num_programs(2) - 1)
    def _():
        o_ref[...] = (acc_ref[...] + b_ref[...].astype(jnp.float32)).astype(o_ref.dtype)


def linear(x2d, w, b, *, tm=256):
    M, K = x2d.shape
    N, K2 = w.shape
    assert K == K2
    if M < tm:
        tm = _round_up(M, 8)
    Mp = _round_up(M, tm)
    if Mp != M:
        x2d = jnp.pad(x2d, ((0, Mp - M), (0, 0)))
    tk = _pick_tile(K)
    tn = _pick_tile(N)
    b2 = jnp.asarray(b).reshape(1, N)

    out = pl.pallas_call(
        _linear_kernel,
        out_shape=jax.ShapeDtypeStruct((Mp, N), x2d.dtype),
        grid_spec=pltpu.PrefetchScalarGridSpec(
            num_scalar_prefetch=0,
            grid=(Mp // tm, N // tn, K // tk),
            in_specs=[
                pl.BlockSpec((tm, tk), lambda i, j, k: (i, k)),
                pl.BlockSpec((tn, tk), lambda i, j, k: (j, k)),  # torch-layout (N, K)
                pl.BlockSpec((1, tn), lambda i, j, k: (0, j)),
            ],
            out_specs=pl.BlockSpec((tm, tn), lambda i, j, k: (i, j)),
            scratch_shapes=[pltpu.VMEM((tm, tn), jnp.float32)],
        ),
        compiler_params=pltpu.CompilerParams(
            dimension_semantics=("parallel", "parallel", "arbitrary")),
    )(x2d, w, b2)
    return out[:M] if Mp != M else out


# ----------------------------------------------------------------------------
# Attention kernel: one (batch, q-block, kv-block) grid step processes ALL heads.
# Q/K/V are (tile, C) slabs pulled directly from the (B, T, 3C) qkv buffer.
# Does rms_norm(q/k), rotary (head-indexed, as in the reference), and causal
# flash attention with running max/sum/acc scratch.
# ----------------------------------------------------------------------------
def _attn_kernel(q_ref, k_ref, v_ref, cos_ref, sin_ref, o_ref,
                 m_ref, l_ref, acc_ref):
    nh, hd = cos_ref.shape
    tq = q_ref.shape[0]
    tkv = k_ref.shape[0]
    d = hd // 2
    scale = 1.0 / math.sqrt(hd)

    i = pl.program_id(1)
    j = pl.program_id(2)
    nj = pl.num_programs(2)

    @pl.when(j == 0)
    def _init():
        m_ref[...] = jnp.full_like(m_ref, -jnp.inf)
        l_ref[...] = jnp.zeros_like(l_ref)
        acc_ref[...] = jnp.zeros_like(acc_ref)

    # Causal block skip: this KV block contributes iff some col <= some row.
    @pl.when(j * tkv < (i + 1) * tq)
    def _compute():
        cos_all = cos_ref[...].astype(jnp.float32)   # (nh, hd)  = [cos, cos]
        sin_all = sin_ref[...].astype(jnp.float32)   # (nh, hd)  = [sin, -sin]

        row = i * tq + lax.broadcasted_iota(jnp.int32, (tq, tkv), 0)
        col = j * tkv + lax.broadcasted_iota(jnp.int32, (tq, tkv), 1)
        causal = col <= row

        def rope(x, cos_full, sin_signed):
            # y = x * [cos, cos] + swap_halves(x) * [sin, -sin]
            if hd % 128 == 0:
                xs = pltpu.roll(x, shift=d, axis=-1)        # XLU slot, ~free
            else:
                xs = jnp.concatenate([x[:, d:], x[:, :d]], axis=-1)
            return x * cos_full + xs * sin_signed

        for h in range(nh):
            sl = slice(h * hd, (h + 1) * hd)
            cos_h = cos_all[h:h + 1, :]                     # (1, hd)
            sin_h = sin_all[h:h + 1, :]

            q_h = q_ref[:, sl].astype(jnp.float32)          # (tq, hd)
            k_h = k_ref[:, sl].astype(jnp.float32)          # (tkv, hd)
            v_h = v_ref[:, sl].astype(jnp.float32)          # (tkv, hd)

            # F.rms_norm over the head dim (no affine weight)
            q_h = q_h * lax.rsqrt(jnp.mean(q_h * q_h, axis=-1, keepdims=True) + _F32_EPS)
            k_h = k_h * lax.rsqrt(jnp.mean(k_h * k_h, axis=-1, keepdims=True) + _F32_EPS)

            # rotary; fold 1/sqrt(hd) into q (scales (tq,hd) instead of (tq,tkv))
            q_h = rope(q_h, cos_h, sin_h) * scale
            k_h = rope(k_h, cos_h, sin_h)

            s = lax.dot_general(q_h, k_h, (((1,), (1,)), ((), ())),
                                preferred_element_type=jnp.float32)  # (tq, tkv)
            s = jnp.where(causal, s, -jnp.inf)

            m_prev = m_ref[:, h:h + 1]                                # (tq, 1)
            m_new = jnp.maximum(m_prev, jnp.max(s, axis=-1, keepdims=True))
            alpha = jnp.exp(m_prev - m_new)
            p = jnp.exp(s - m_new)
            l_ref[:, h:h + 1] = alpha * l_ref[:, h:h + 1] + jnp.sum(p, axis=-1, keepdims=True)
            acc_ref[h] = alpha * acc_ref[h] + jnp.dot(p, v_h, preferred_element_type=jnp.float32)
            m_ref[:, h:h + 1] = m_new

    @pl.when(j == nj - 1)
    def _finalize():
        outs = []
        for h in range(nh):
            inv_l = pl.reciprocal(l_ref[:, h:h + 1], approx=True)     # EUP slot
            outs.append(acc_ref[h] * inv_l)
        # single lane-dense (tq, C) store; HBM writeback of this block is unmasked
        o_ref[...] = jnp.concatenate(outs, axis=-1).astype(o_ref.dtype)


def attention(qkv, cos_full, sin_signed, n_head, *, block_q=256):
    B, T, C3 = qkv.shape
    C = C3 // 3
    nh = n_head
    hd = C // nh
    assert C % 128 == 0, "n_embd must be a multiple of 128 for lane-dense blocks"

    if T <= block_q:
        tq = T
    else:
        tq = next((c for c in (block_q, 256, 128, 64, 32, 16, 8) if T % c == 0), T)
    tkv = tq
    ni, nj = T // tq, T // tkv

    def q_map(b, i, j):
        return (b, i, 0)

    def k_map(b, i, j):
        # clamp to the last causally-relevant KV block so skipped (fully masked)
        # steps don't re-fetch K/V the kernel never reads
        return (b, jnp.minimum(j, ((i + 1) * tq - 1) // tkv), 1)

    def v_map(b, i, j):
        return (b, jnp.minimum(j, ((i + 1) * tq - 1) // tkv), 2)

    return pl.pallas_call(
        _attn_kernel,
        out_shape=jax.ShapeDtypeStruct((B, T, C), qkv.dtype),
        grid_spec=pltpu.PrefetchScalarGridSpec(
            num_scalar_prefetch=0,
            grid=(B, ni, nj),
            in_specs=[
                pl.BlockSpec((None, tq, C), q_map),        # Q columns of qkv
                pl.BlockSpec((None, tkv, C), k_map),       # K columns of qkv
                pl.BlockSpec((None, tkv, C), v_map),       # V columns of qkv
                pl.BlockSpec((nh, hd), lambda b, i, j: (0, 0)),
                pl.BlockSpec((nh, hd), lambda b, i, j: (0, 0)),
            ],
            out_specs=pl.BlockSpec((None, tq, C), lambda b, i, j: (b, i, 0)),
            scratch_shapes=[
                pltpu.VMEM((tq, nh), jnp.float32),         # running max per head
                pltpu.VMEM((tq, nh), jnp.float32),         # running sum per head
                pltpu.VMEM((nh, tq, hd), jnp.float32),     # output accumulator
            ],
        ),
        compiler_params=pltpu.CompilerParams(
            dimension_semantics=("parallel", "parallel", "arbitrary"),
            vmem_limit_bytes=48 * 1024 * 1024),
    )(qkv, qkv, qkv, cos_full, sin_signed)


# ----------------------------------------------------------------------------
# Full CausalSelfAttention forward
# ----------------------------------------------------------------------------
def causal_self_attention(x, w_attn, b_attn, w_proj, b_proj, n_head):
    B, T, C = x.shape
    hd = C // n_head

    # qkv projection; stays (B, T, 3C) — the attention kernel slices Q/K/V head
    # blocks straight out of it (no HBM transposes, only free reshapes).
    qkv = linear(x.reshape(B * T, C), w_attn, b_attn).reshape(B, T, 3 * C)

    # Rotary tables. NOTE: the reference Rotary module uses x.shape[1] of the
    # (B, nh, T, hd) tensor as "seq_len", i.e. frequencies are indexed by HEAD
    # index (nh rows), broadcast over B and T.  Reproduced exactly.
    inv_freq = 1.0 / (10000.0 ** (jnp.arange(0, hd, 2, dtype=jnp.float32) / hd))
    t = jnp.arange(n_head, dtype=jnp.float32)
    freqs = jnp.outer(t, inv_freq)                           # (nh, hd//2)
    cos = jnp.cos(freqs)
    sin = jnp.sin(freqs)
    cos_full = jnp.concatenate([cos, cos], axis=-1)          # (nh, hd)   [cos, cos]
    sin_signed = jnp.concatenate([sin, -sin], axis=-1)       # (nh, hd)   [sin, -sin]

    y = attention(qkv, cos_full, sin_signed, n_head)         # (B, T, C), lane-dense
    y = linear(y.reshape(B * T, C), w_proj, b_proj).reshape(B, T, C)
    return y


# ----------------------------------------------------------------------------
# Pure-JAX reference for correctness checking
# ----------------------------------------------------------------------------
def _reference(x, w_attn, b_attn, w_proj, b_proj, n_head):
    B, T, C = x.shape
    hd = C // n_head
    qkv = x @ w_attn.T + b_attn
    q, k, v = qkv[..., :C], qkv[..., C:2 * C], qkv[..., 2 * C:]
    q = q.reshape(B, T, n_head, hd).transpose(0, 2, 1, 3)
    k = k.reshape(B, T, n_head, hd).transpose(0, 2, 1, 3)
    v = v.reshape(B, T, n_head, hd).transpose(0, 2, 1, 3)
    inv_freq = 1.0 / (10000.0 ** (jnp.arange(0, hd, 2, dtype=jnp.float32) / hd))
    freqs = jnp.outer(jnp.arange(n_head, dtype=jnp.float32), inv_freq)
    cos = jnp.cos(freqs)[None, :, None, :]
    sin = jnp.sin(freqs)[None, :, None, :]

    def rms(a):
        return a * jax.lax.rsqrt(jnp.mean(a * a, -1, keepdims=True) + _F32_EPS)

    def rope(a):
        d2 = a.shape[-1] // 2
        a1, a2 = a[..., :d2], a[..., d2:]
        return jnp.concatenate([a1 * cos + a2 * sin, -a1 * sin + a2 * cos], -1)

    q, k = rope(rms(q)), rope(rms(k))
    s = jnp.einsum("bhqd,bhkd->bhqk", q, k) / math.sqrt(hd)
    mask = jnp.tril(jnp.ones((T, T), bool))
    s = jnp.where(mask[None, None], s, -jnp.inf)
    p = jax.nn.softmax(s, axis=-1)
    y = jnp.einsum("bhqk,bhkd->bhqd", p, v)
    y = y.transpose(0, 2, 1, 3).reshape(B, T, C)
    return y @ w_proj.T + b_proj


if __name__ == "__main__":
    # Small config consistent with the module (n_embd multiple of 128, n_embd % n_head == 0)
    B, T, C, n_head = 2, 128, 128, 4

    key = jax.random.PRNGKey(0)
    kx, k1, k2, k3, k4 = jax.random.split(key, 5)

    x = jax.random.normal(kx, (B, T, C), dtype=jnp.float32)

    # nn.Linear default init: U(-1/sqrt(fan_in), 1/sqrt(fan_in))
    bound = 1.0 / math.sqrt(C)
    w_attn = jax.random.uniform(k1, (3 * C, C), jnp.float32, -bound, bound)
    b_attn = jax.random.uniform(k2, (3 * C,), jnp.float32, -bound, bound)
    w_proj = jax.random.uniform(k3, (C, C), jnp.float32, -bound, bound)
    b_proj = jax.random.uniform(k4, (C,), jnp.float32, -bound, bound)

    y = causal_self_attention(x, w_attn, b_attn, w_proj, b_proj, n_head)
    y = jax.block_until_ready(y)

    y_ref = _reference(x, w_attn, b_attn, w_proj, b_proj, n_head)
    assert y.shape == (B, T, C)
    # tolerance allows for the EUP approximate reciprocal in the softmax epilogue
    assert jnp.allclose(y, y_ref, atol=3e-3, rtol=3e-3), "mismatch vs reference"

    print("KERNEL_OK")
</pallas_src>

<mosaic_0001>
module attributes {stable_mosaic.version = 11 : i64} {
  func.func @_linear_kernel(%arg0: i32, %arg1: i32, %arg2: i32, %arg3: memref<256x128xf32, #tpu.memory_space<vmem>>, %arg4: memref<128x128xf32, #tpu.memory_space<vmem>>, %arg5: memref<1x128xf32, #tpu.memory_space<vmem>>, %arg6: memref<256x128xf32, #tpu.memory_space<vmem>>, %arg7: memref<256x128xf32, #tpu.memory_space<vmem>>) attributes {dimension_semantics = [#tpu.dimension_semantics<parallel>, #tpu.dimension_semantics<parallel>, #tpu.dimension_semantics<arbitrary>], iteration_bounds = array<i64: 1, 3, 1>, scalar_prefetch = 0 : i64, scratch_operands = 1 : i64, tpu.core_type = #tpu.core_type<tc>, window_params = [{transform_indices = @transform_0, window_bounds = array<i64: 256, 128>}, {transform_indices = @transform_1, window_bounds = array<i64: 128, 128>}, {transform_indices = @transform_2, window_bounds = array<i64: 1, 128>}, {transform_indices = @transform_3, window_bounds = array<i64: 256, 128>}]} {
    %c0_i32 = arith.constant 0 : i32
    %0 = arith.cmpi eq, %arg2, %c0_i32 : i32
    %1 = arith.extui %0 : i1 to i32
    %c0_i32_0 = arith.constant 0 : i32
    %2 = arith.cmpi ne, %1, %c0_i32_0 : i32
    scf.if %2 {
      %cst_10 = arith.constant 0.000000e+00 : f32
      %12 = vector.broadcast %cst_10 : f32 to vector<256x128xf32>
      %c0_11 = arith.constant 0 : index
      %c0_12 = arith.constant 0 : index
      %13 = vector.load %arg7[%c0_11, %c0_12] : memref<256x128xf32, #tpu.memory_space<vmem>>, vector<256x128xf32>
      tpu.vector_store %arg7[%c0_11, %c0_12], %12 {strides = array<i32>} : memref<256x128xf32, #tpu.memory_space<vmem>>, vector<256x128xf32>,
    } else {
    }
    %c0 = arith.constant 0 : index
    %c0_1 = arith.constant 0 : index
    %3 = vector.load %arg7[%c0, %c0_1] : memref<256x128xf32, #tpu.memory_space<vmem>>, vector<256x128xf32>
    %c0_2 = arith.constant 0 : index
    %c0_3 = arith.constant 0 : index
    %4 = vector.load %arg3[%c0_2, %c0_3] : memref<256x128xf32, #tpu.memory_space<vmem>>, vector<256x128xf32>
    %c0_4 = arith.constant 0 : index
    %c0_5 = arith.constant 0 : index
    %5 = vector.load %arg4[%c0_4, %c0_5] : memref<128x128xf32, #tpu.memory_space<vmem>>, vector<128x128xf32>
    %cst = arith.constant dense<0.000000e+00> : vector<256x128xf32>
    %6 = tpu.matmul %4, %5, %cst {dimension_numbers = #tpu.dot_dimension_numbers<[1], [1], [0], [0], [0, 0, 1, 0], [], []>} : vector<256x128xf32>, vector<128x128xf32>, vector<256x128xf32> -> vector<256x128xf32>
    %7 = arith.addf %3, %6 : vector<256x128xf32>
    %c0_6 = arith.constant 0 : index
    %c0_7 = arith.constant 0 : index
    %8 = vector.load %arg7[%c0_6, %c0_7] : memref<256x128xf32, #tpu.memory_space<vmem>>, vector<256x128xf32>
    tpu.vector_store %arg7[%c0_6, %c0_7], %7 {strides = array<i32>} : memref<256x128xf32, #tpu.memory_space<vmem>>, vector<256x128xf32>,
    %c0_i32_8 = arith.constant 0 : i32
    %9 = arith.cmpi eq, %arg2, %c0_i32_8 : i32
    %10 = arith.extui %9 : i1 to i32
    %c0_i32_9 = arith.constant 0 : i32
    %11 = arith.cmpi ne, %10, %c0_i32_9 : i32
    scf.if %11 {
      %c0_10 = arith.constant 0 : index
      %c0_11 = arith.constant 0 : index
      %12 = vector.load %arg7[%c0_10, %c0_11] : memref<256x128xf32, #tpu.memory_space<vmem>>, vector<256x128xf32>
      %c0_12 = arith.constant 0 : index
      %c0_13 = arith.constant 0 : index
      %13 = vector.load %arg5[%c0_12, %c0_13] : memref<1x128xf32, #tpu.memory_space<vmem>>, vector<1x128xf32>
      %14 = vector.broadcast %13 : vector<1x128xf32> to vector<256x128xf32>
      %15 = arith.addf %12, %14 : vector<256x128xf32>
      %c0_14 = arith.constant 0 : index
      %c0_15 = arith.constant 0 : index
      %16 = vector.load %arg6[%c0_14, %c0_15] : memref<256x128xf32, #tpu.memory_space<vmem>>, vector<256x128xf32>
      tpu.vector_store %arg6[%c0_14, %c0_15], %15 {strides = array<i32>} : memref<256x128xf32, #tpu.memory_space<vmem>>, vector<256x128xf32>,
    } else {
    }
    return
  }
  func.func @transform_0(%arg0: i32, %arg1: i32, %arg2: i32) -> (i32, i32) {
    %c0_i32 = arith.constant 0 : i32
    return %arg0, %arg2 : i32, i32
  }
  func.func @transform_1(%arg0: i32, %arg1: i32, %arg2: i32) -> (i32, i32) {
    %c0_i32 = arith.constant 0 : i32
    return %arg1, %arg2 : i32, i32
  }
  func.func @transform_2(%arg0: i32, %arg1: i32, %arg2: i32) -> (i32, i32) {
    %c0_i32 = arith.constant 0 : i32
    %c0_i32_0 = arith.constant 0 : i32
    return %c0_i32, %arg1 : i32, i32
  }
  func.func @transform_3(%arg0: i32, %arg1: i32, %arg2: i32) -> (i32, i32) {
    %c0_i32 = arith.constant 0 : i32
    return %arg0, %arg1 : i32, i32
  }
}

</mosaic_0001>

<bundles_post_ra>
// kernel: tpu_custom_call.1
= control target key start
LH: loop header
LB: loop body
LE: loop exit
PB: predicated region body
PF: predicated region fallthrough
CT: control target
= control target key end

     0   :  { %8 = vsyncpa [#allocation4], 0  ;;  %s1658_s0 = inlined_call_operand.hbm [shape: f32[256,128], index: 0, kind: input, shape index: {}]   ;;  %s1659_s1 = inlined_call_operand.hbm [shape: f32[384,128], index: 1, kind: input, shape index: {}]   ;;  %s1660_s2 = inlined_call_operand.vmem [shape: f32[1,384], index: 2, kind: input, shape index: {}]   ;;  %s1661_s3 = inlined_call_operand.hbm [shape: f32[256,384], index: 3, kind: output, shape index: {}]  }
   0x1   :  { %9 = vsyncpa [#allocation7], 0 }
   0x2   :  { %11 = vsyncpa [#allocation7 + $0x1], 0 }
   0x3   :  { %12 = vsyncpa [#allocation5], 0 }
   0x4   :  { %14 = vsyncpa [#allocation5 + $0x1], 0  ;;  %s1342_s12 = smov 0   ;;  %s1344_s13 = smov 0  }
   0x5   :  { %s1346_s14 = smov 0   ;;  %s1348_s15 = smov 0  }
   0x6   :  { %s1350_s16 = smov 0   ;;  %s1352_s17 = smov 0  }
   0x7 LB: > { %s896_s18 = sadd.s32 4294967295, %s1312_s17   ;;  %s897_s19 = sadd.s32 4294967294, %s1312_s17   ;;  %s1312_s17 = sphi %s1352_s17, %s20_s17   ;;  %s1308_s16 = sphi %s1350_s16, %s1684_s16   ;;  %s1304_s15 = sphi %s1348_s15, %s1683_s15   ;;  %s1300_s14 = sphi %s1346_s14, %s1682_s14   ;;  %s1296_s13 = sphi %s1344_s13, %s1681_s13   ;;  %s1292_s12 = sphi %s1342_s12, %s1680_s12  }
   0x8   : > { %p89_p0 = scmp.ne.s32.totalorder %s1296_s13, %s1292_s12  ;;  %p1376_p1 = scmp.eq.s32.totalorder %s896_s18, 0 }
   0x9   : > { %p1380_p2 = scmp.eq.s32.totalorder %s896_s18, 2  ;;  %p147_p3 = scmp.eq.s32.totalorder %s897_s19, 2 }
   0xa   : > { %s1666_s20 = scalar_select %p1376_p1, 1, 0 }
   0xb   : > { %s1667_s21 = scalar_select %p1380_p2, 1, 0 }
   0xc   : > { %p1386_p4 = por %p1376_p1, %p89_p0  ;;  %p898_p5 = scmp.ge.s32.totalorder %s1312_s17, 1 }
   0xd   : > { %p1391_p6 = por %p147_p3, %p89_p0  ;;  %p154_p7 = scmp.lt.s32.totalorder %s1312_s17, 4 }
   0xe   : > { %s1668_s22 = scalar_select %p1386_p4, 1, 0 }
   0xf   : > { %s1669_s23 = scalar_select %p1391_p6, 1, 0 }
  0x10   : > { %p1396_p8 = pnand %p898_p5, %p154_p7  ;;  %s1314_s25 = smov [#allocation3]  }
  0x11   : > { %s170_s26 = sshll.u32 %s1314_s25, 4  ;;  %s35_s28 = sadd.s32 1, %s1308_s16  ;;  %s171_s26 = int_to_ptr.vmem [resolvable:$true] %s170_s26 }
  0x12   : > { %s1670_s24 = scalar_select %p1396_p8, 1, 0 }
  0x13   : > { %p1098_p9 = pneg %p1396_p8  ;;  %s1168_s4 = scalar_lea.hbm %s1658_s0, 4096 }
  0x14   : > { %p1169_p11 = scmp.ne.s32.totalorder %s1658_s0, %s1168_s4  ;;  %p1175_p3 = scmp.lt.u32.totalorder %s1168_s4, %s1658_s0 }
  0x15   : > { %p1404_p10 = pnand %p1098_p9, %p1376_p1 }
  0x17   : > { %p1170_p12 = pneg %p1404_p10 }
  0x19   : > { %p1171_p13 = pnand %p1170_p12, %p1169_p11 }
  0x1b   : > { %p1172_p0 = pneg %p1171_p13 }
  0x1d   : > { %p1177_p5 = pnand %p1175_p3, %p1172_p0 }
  0x1f   : > { %1180 = shalt.err (!%p1177_p5)
}
  0x20   : > { %s1181_s9 = scalar_lea.vmem %s171_s26, 4096  ;;  %p1189_p4 = scmp.lt.s32.totalorder %s171_s26, %s171_s26 }
  0x21   : > { %p1182_p7 = scmp.ne.s32.totalorder %s171_s26, %s1181_s9  ;;  %p1190_p1 = scmp.lt.s32.totalorder %s1181_s9, %s1181_s9 }
  0x23   : > { %p1184_p9 = pnand %p1182_p7, %p1170_p12  ;;  %p1191_p8 = por %p1190_p1, %p1189_p4 }
  0x25   : > { %p1185_p6 = pneg %p1184_p9 }
  0x27   : > { %p1192_p2 = pnand %p1191_p8, %p1185_p6 }
  0x29   : > { %1195 = shalt.err (!%p1192_p2)
}
  0x2a   : > { %s1315_s10 = smov 128   ;;  %s1316_s11 = smov 8  }
  0x2b   : > { %1101 = dma.hbm_to_vmem [thread:$0]  (!%p1404_p10), %s1658_s0, 4096, %s171_s26, [#allocation4], %s1315_s10, %s1315_s10, %s1316_s11  }
  0x2c   : > { %p37_p1 = scmp.ge.s32.totalorder %s35_s28, 3  ;;  %s76_s25 = sadd.s32 1, %s1300_s14 }
  0x2d   : > { %p83_p2 = scmp.ne.s32.totalorder %s1300_s14, %s1296_s13  ;;  %p84_p4 = scmp.eq.s32.totalorder %s1312_s17, 0 }
  0x2e   : > { %s1686_s28 = smov (%p37_p1, %s35_s28), 0  ;;  %p1673_p8 = scmp.ne.s32.totalorder %s1667_s21, 0 }
  0x2f   : > { %p1434_p6 = por %p84_p4, %p83_p2  ;;  %s71_s30 = ssub.s32 %s1308_s16, %s1686_s28 }
  0x30   : > { %p1440_p11 = por %p1673_p8, %p83_p2  ;;  %p1111_p12 = scmp.lt.s32.totalorder %s1312_s17, 3 }
  0x31   : > { %p74_p10 = scmp.eq.s32.totalorder %s71_s30, 0  ;;  %s184_s26 = sand.u32 1, %s1300_s14  }
  0x32   : > { %s901_s4 = sshll.u32 %s184_s26, 7  ;;  %s913_s6 = sshll.u32 %s1308_s16, 11 }
  0x33   : > { %s1449_s5 = scalar_select %p74_p10, %s1300_s14, %s76_s25  }
  0x34   : > { %s1455_s9 = scalar_lea.hbm %s1659_s1, %s913_s6  ;;  %s188_s21 = scalar_lea.vmem [#allocation6], %s901_s4 }
  0x35   : > { %s196_s18 = sshll.u32 %s188_s21, 4  ;;  %p1461_p13 = pnand %p1111_p12, %p1434_p6  ;;  %s1457_s18 = int_to_ptr.vmem [resolvable:$true] %s196_s18 }
  0x36   : > { %s1465_s25 = scalar_lea.sflag [#allocation7], %s184_s26  ;;  %s1196_s30 = scalar_lea.hbm %s1455_s9, 2048 }
  0x37   : > { %p1197_p0 = scmp.ne.s32.totalorder %s1455_s9, %s1196_s30  ;;  %p1198_p3 = pneg %p1461_p13 }
  0x38   : > { %s1201_s29 = scalar_lea.hbm %s1659_s1, 6144  ;;  %p1202_p9 = scmp.lt.u32.totalorder %s1455_s9, %s1659_s1 }
  0x39   : > { %p1199_p5 = pnand %p1198_p3, %p1197_p0  ;;  %p1203_p1 = scmp.lt.u32.totalorder %s1201_s29, %s1196_s30 }
  0x3a   : > { %p1205_p4 = scmp.lt.u32.totalorder %s1196_s30, %s1455_s9 }
  0x3b   : > { %p1200_p7 = pneg %p1199_p5  ;;  %p1204_p2 = por %p1203_p1, %p1202_p9 }
  0x3d   : > { %p1206_p6 = por %p1205_p4, %p1204_p2 }
  0x3f   : > { %p1207_p8 = pnand %p1206_p6, %p1200_p7 }
  0x41   : > { %1210 = shalt.err (!%p1207_p8)
}
  0x42   : > { %s1211_s26 = scalar_lea.vmem %s1457_s18, 2048  ;;  %s1317_s21 = smov [#allocation6]  }
  0x43   : > { %p1212_p12 = scmp.ne.s32.totalorder %s1457_s18, %s1211_s26  ;;  %s1216_s4 = sshll.u32 %s1317_s21, 4  ;;  %s1217_s4 = int_to_ptr.vmem [resolvable:$false] %s1216_s4 }
  0x44   : > { %s1218_s6 = scalar_lea.vmem %s1217_s4, 4096  ;;  %p1219_p5 = scmp.lt.s32.totalorder %s1457_s18, %s1217_s4 }
  0x45   : > { %p1214_p10 = pnand %p1212_p12, %p1198_p3  ;;  %p1220_p9 = scmp.lt.s32.totalorder %s1218_s6, %s1211_s26 }
  0x47   : > { %p1215_p0 = pneg %p1214_p10  ;;  %p1221_p1 = por %p1220_p9, %p1219_p5 }
  0x49   : > { %p1222_p2 = pnand %p1221_p1, %p1215_p0 }
  0x4b   : > { %1225 = shalt.err (!%p1222_p2)
}
  0x4c   : > { %1105 = dma.hbm_to_vmem [thread:$0]  (!%p1461_p13), %s1455_s9, 2048, %s1457_s18, %s1465_s25, %s1315_s10, %s1315_s10, %s1316_s11  }
  0x4d   : > { %p1676_p3 = scmp.ne.s32.totalorder %s1670_s24, 0 }
  0x4e   : > { %p1677_p7 = scmp.ne.s32.totalorder (!%p1676_p3), %s1666_s20, 0 }
  0x4f   : > { %214 = sbr.rel (%p1676_p3) target bundleno = 417 (0x1a1), region = 32 }
  0x56   : > { %1279 = dma.done.wait (%p1677_p7), [#allocation4], 4096  }
  0x57   : > { %1281 = vsyncadd (%p1677_p7), [#allocation4], 4294963200  ;;  %s1503_s30 = sand.u32 1, %s1296_s13   ;;  %p1678_p13 = scmp.ne.s32.totalorder %s1668_s22, 0 }
  0x58   : > { %s906_s19 = sshll.u32 %s1503_s30, 7  ;;  %s221_s29 = scalar_lea.sflag [#allocation7], %s1503_s30 }
  0x59   : > { %s1507_s7 = scalar_lea.vmem [#allocation6], %s906_s19 }
  0x5a   : > { %1283 = dma.done.wait (%p1678_p13), %s221_s29, 2048  }
  0x5b   : > { %1285 = vsyncadd (%p1678_p13), %s221_s29, 4294965248  ;;  %v356_v0 = vld [vmem:[%s1507_s7] sm:$0xff]  ;;  %v357_v1 = vld [vmem:[%s1507_s7 + $0x8] sm:$0xff]  ;;  %p252_p4 = scmp.lt.s32.totalorder %s1304_s15, 2  ;;  %s907_s11 = sshll.u32 %s1503_s30, 8 }
  0x5c   : > { %v358_v2 = vld [vmem:[%s1507_s7 + $0x10] sm:$0xff]  ;;  %v1042_v3 = vpack.c.bf16 %v357_v1, %v356_v0  ;;  %v359_v4 = vld [vmem:[%s1507_s7 + $0x18] sm:$0xff]  ;;  %v324_v6 = vld [vmem:[#allocation3] sm:$0xff]  ;;  %s1541_s9 = scalar_lea.vmem [#allocation8], %s907_s11  ;;  %s910_s18 = sshll.u32 %s1304_s15, 7 }
  0x5d   : > { %v1046_v5 = vpack.c.bf16 %v359_v4, %v358_v2  ;;  %v340_v7 = vld [vmem:[#allocation3 + $0x80] sm:$0xff]  ;;  %v361_v9 = vld [vmem:[%s1507_s7 + $0x28] sm:$0xff]  ;;  %994 = vmatprep.mubr.f32.mxu0 %v324_v6  ;;  %v362_v11 = vld [vmem:[%s1507_s7 + $0x30] sm:$0xff]  ;;  %s253_s20 = scalar_select %p252_p4, %s1304_s15, 2 }
  0x5e   : > { %1043 = vmatprep.subr.bf16.mxu0 %v1042_v3  ;;  %1074 = vmatprep.subr.bf16.mxu1 %v1042_v3  ;;  %v360_v8 = vld [vmem:[%s1507_s7 + $0x20] sm:$0xff]  ;;  %v363_v12 = vld [vmem:[%s1507_s7 + $0x38] sm:$0xff]  ;;  %v365_v15 = vld [vmem:[%s1507_s7 + $0x48] sm:$0xff]  ;;  %s783_s25 = sshll.u32 %s1541_s9, 4  ;;  %s1600_s15 = scalar_lea.hbm %s1661_s3, %s910_s18  ;;  %s1604_s25 = int_to_ptr.vmem [resolvable:$true] %s783_s25 }
  0x5f   : > { %1045 = vmatpush3.bf16.xpose.msra.mxu0 %v1042_v3  ;;  %1082 = vmatpush3.bf16.xpose.msra.mxu1 %v1042_v3  ;;  %v1050_v10 = vpack.c.bf16 %v361_v9, %v360_v8  ;;  %v1054_v13 = vpack.c.bf16 %v363_v12, %v362_v11  ;;  %v364_v14 = vld [vmem:[%s1507_s7 + $0x40] sm:$0xff]  ;;  %v366_v17 = vld [vmem:[%s1507_s7 + $0x50] sm:$0xff]  ;;  %v367_v18 = vld [vmem:[%s1507_s7 + $0x58] sm:$0xff]  ;;  %s254_s10 = scalar_lea.vmem %s1660_s2, %s253_s20  ;;  %s768_s21 = scalar_lea.sflag [#allocation5], %s1503_s30 }
  0x60   : > { %1047 = vmatprep.subr.bf16.mxu0 %v1046_v5  ;;  %1075 = vmatprep.subr.bf16.mxu1 %v1046_v5  ;;  %v1058_v16 = vpack.c.bf16 %v365_v15, %v364_v14  ;;  %v1062_v19 = vpack.c.bf16 %v367_v18, %v366_v17  ;;  %v368_v20 = vld [vmem:[%s1507_s7 + $0x60] sm:$0xff]  ;;  %v369_v21 = vld [vmem:[%s1507_s7 + $0x68] sm:$0xff]  ;;  %v370_v23 = vld [vmem:[%s1507_s7 + $0x70] sm:$0xff]  ;;  %s1226_s4 = scalar_lea.vmem %s1604_s25, 4096  ;;  %s1318_s6 = smov [#allocation8]  }
  0x61   : > { %1018 = vmatprep.mubr.f32.mxu1 %v340_v7  ;;  %v1066_v22 = vpack.c.bf16 %v369_v21, %v368_v20  ;;  %v371_v24 = vld [vmem:[%s1507_s7 + $0x78] sm:$0xff]  ;;  %v325_v26 = vld [vmem:[#allocation3 + $0x8] sm:$0xff]  ;;  %v326_v28 = vld [vmem:[#allocation3 + $0x10] sm:$0xff]  ;;  %p1227_p6 = scmp.ne.s32.totalorder %s1604_s25, %s1226_s4  ;;  %s1230_s19 = sshll.u32 %s1318_s6, 4  ;;  %s1231_s19 = int_to_ptr.vmem [resolvable:$false] %s1230_s19 }
  0x62   : > { %v1070_v25 = vpack.c.bf16 %v371_v24, %v370_v23  ;;  %v341_v27 = vld [vmem:[#allocation3 + $0x88] sm:$0xff]  ;;  %v342_v29 = vld [vmem:[#allocation3 + $0x90] sm:$0xff]  ;;  %v327_v30 = vld [vmem:[#allocation3 + $0x18] sm:$0xff]  ;;  %s1232_s29 = scalar_lea.vmem %s1231_s19, 8192  ;;  %p1233_p10 = scmp.lt.s32.totalorder %s1604_s25, %s1231_s19 }
  0x63   : > { %v343_v31 = vld [vmem:[#allocation3 + $0x98] sm:$0xff]  ;;  %v328_v32 = vld [vmem:[#allocation3 + $0x20] sm:$0xff]  ;;  %v329_v34 = vld [vmem:[#allocation3 + $0x28] sm:$0xff]  ;;  %p1228_p8 = pnand %p1227_p6, %p1440_p11  ;;  %p1234_p0 = scmp.lt.s32.totalorder %s1232_s29, %s1226_s4 }
  0x64   : > { %v344_v33 = vld [vmem:[#allocation3 + $0xa0] sm:$0xff]  ;;  %v345_v35 = vld [vmem:[#allocation3 + $0xa8] sm:$0xff]  ;;  %v330_v36 = vld [vmem:[#allocation3 + $0x30] sm:$0xff] }
  0x65   : > { %v346_v37 = vld [vmem:[#allocation3 + $0xb0] sm:$0xff]  ;;  %v331_v38 = vld [vmem:[#allocation3 + $0x38] sm:$0xff]  ;;  %v332_v40 = vld [vmem:[#allocation3 + $0x40] sm:$0xff]  ;;  %p1229_p12 = pneg %p1228_p8  ;;  %p1235_p5 = por %p1234_p0, %p1233_p10 }
  0x66   : > { %v347_v39 = vld [vmem:[#allocation3 + $0xb8] sm:$0xff]  ;;  %v348_v41 = vld [vmem:[#allocation3 + $0xc0] sm:$0xff]  ;;  %v333_v42 = vld [vmem:[#allocation3 + $0x48] sm:$0xff] }
  0x67   : > { %1049 = vmatpush3.bf16.xpose.msra.mxu0 %v1046_v5  ;;  %1083 = vmatpush3.bf16.xpose.msra.mxu1 %v1046_v5  ;;  %v349_v43 = vld [vmem:[#allocation3 + $0xc8] sm:$0xff]  ;;  %v334_v44 = vld [vmem:[#allocation3 + $0x50] sm:$0xff]  ;;  %v335_v46 = vld [vmem:[#allocation3 + $0x58] sm:$0xff]  ;;  %p1236_p9 = pnand %p1235_p5, %p1229_p12 }
  0x68   : > { %1051 = vmatprep.subr.bf16.mxu0 %v1050_v10  ;;  %1076 = vmatprep.subr.bf16.mxu1 %v1050_v10  ;;  %v350_v45 = vld [vmem:[#allocation3 + $0xd0] sm:$0xff]  ;;  %v351_v47 = vld [vmem:[#allocation3 + $0xd8] sm:$0xff]  ;;  %v336_v48 = vld [vmem:[#allocation3 + $0x60] sm:$0xff] }
  0x69   : > { %v352_v49 = vld [vmem:[#allocation3 + $0xe0] sm:$0xff]  ;;  %v337_v50 = vld [vmem:[#allocation3 + $0x68] sm:$0xff]  ;;  %v338_v52 = vld [vmem:[#allocation3 + $0x70] sm:$0xff] }
  0x6a   : > { %v353_v51 = vld [vmem:[#allocation3 + $0xe8] sm:$0xff]  ;;  %v354_v53 = vld [vmem:[#allocation3 + $0xf0] sm:$0xff]  ;;  %v339_v54 = vld [vmem:[#allocation3 + $0x78] sm:$0xff] }
  0x6b   : > { %v355_v55 = vld [vmem:[#allocation3 + $0xf8] sm:$0xff]  ;;  %v1535_v56 = vld [vmem:[%s254_s10] ss:$0 sm:$0xff] }
  0x6f   : > { %1053 = vmatpush3.bf16.xpose.msra.mxu0 %v1050_v10  ;;  %1084 = vmatpush3.bf16.xpose.msra.mxu1 %v1050_v10 }
  0x70   : > { %1055 = vmatprep.subr.bf16.mxu0 %v1054_v13  ;;  %1077 = vmatprep.subr.bf16.mxu1 %v1054_v13 }
  0x77   : > { %1057 = vmatpush3.bf16.xpose.msra.mxu0 %v1054_v13  ;;  %1085 = vmatpush3.bf16.xpose.msra.mxu1 %v1054_v13 }
  0x78   : > { %1059 = vmatprep.subr.bf16.mxu0 %v1058_v16  ;;  %1078 = vmatprep.subr.bf16.mxu1 %v1058_v16 }
  0x7f   : > { %1061 = vmatpush3.bf16.xpose.msra.mxu0 %v1058_v16  ;;  %1086 = vmatpush3.bf16.xpose.msra.mxu1 %v1058_v16 }
  0x80   : > { %1063 = vmatprep.subr.bf16.mxu0 %v1062_v19  ;;  %1079 = vmatprep.subr.bf16.mxu1 %v1062_v19 }
  0x87   : > { %1065 = vmatpush3.bf16.xpose.msra.mxu0 %v1062_v19  ;;  %1087 = vmatpush3.bf16.xpose.msra.mxu1 %v1062_v19 }
  0x88   : > { %1067 = vmatprep.subr.bf16.mxu0 %v1066_v22  ;;  %1080 = vmatprep.subr.bf16.mxu1 %v1066_v22 }
  0x8f   : > { %1069 = vmatpush3.bf16.xpose.msra.mxu0 %v1066_v22  ;;  %1088 = vmatpush3.bf16.xpose.msra.mxu1 %v1066_v22 }
  0x90   : > { %1071 = vmatprep.subr.bf16.mxu0 %v1070_v25  ;;  %1081 = vmatprep.subr.bf16.mxu1 %v1070_v25 }
  0x97   : > { %1073 = vmatpush3.bf16.xpose.msra.mxu0 %v1070_v25  ;;  %1089 = vmatpush3.bf16.xpose.msra.mxu1 %v1070_v25 }
  0x9e   : > { %995 = vmatmul.mubr.f32.vlgmr.msra.gmra.mrb[0].mxu0 %v325_v26  ;;  %1019 = vmatmul.mubr.f32.vlgmr.msra.gmra.mrb[0].mxu1 %v341_v27 }
  0x9f   : > { %997 = vmatprep.mubr.f32.mxu0 %v326_v28  ;;  %1021 = vmatprep.mubr.f32.mxu1 %v342_v29 }
  0xa2   : > { %998 = vmatmul.mubr.f32.gmra.mrb[2].mxu0 %v327_v30  ;;  %1022 = vmatmul.mubr.f32.gmra.mrb[2].mxu1 %v343_v31 }
  0xa3   : > { %1000 = vmatprep.mubr.f32.mxu0 %v328_v32  ;;  %1024 = vmatprep.mubr.f32.mxu1 %v344_v33 }
  0xa6   : > { %1001 = vmatmul.mubr.f32.gmra.mrb[4].mxu0 %v329_v34  ;;  %1025 = vmatmul.mubr.f32.gmra.mrb[4].mxu1 %v345_v35 }
  0xa7   : > { %1003 = vmatprep.mubr.f32.mxu0 %v330_v36  ;;  %1027 = vmatprep.mubr.f32.mxu1 %v346_v37 }
  0xaa   : > { %1004 = vmatmul.mubr.f32.gmra.mrb[6].mxu0 %v331_v38  ;;  %1028 = vmatmul.mubr.f32.gmra.mrb[6].mxu1 %v347_v39 }
  0xab   : > { %1006 = vmatprep.mubr.f32.mxu0 %v332_v40  ;;  %1030 = vmatprep.mubr.f32.mxu1 %v348_v41 }
  0xae   : > { %1007 = vmatmul.mubr.f32.gmra.mrb[8].mxu0 %v333_v42  ;;  %1031 = vmatmul.mubr.f32.gmra.mrb[8].mxu1 %v349_v43 }
  0xaf   : > { %1009 = vmatprep.mubr.f32.mxu0 %v334_v44  ;;  %1033 = vmatprep.mubr.f32.mxu1 %v350_v45 }
  0xb2   : > { %1010 = vmatmul.mubr.f32.gmra.mrb[10].mxu0 %v335_v46  ;;  %1034 = vmatmul.mubr.f32.gmra.mrb[10].mxu1 %v351_v47 }
  0xb3   : > { %1012 = vmatprep.mubr.f32.mxu0 %v336_v48  ;;  %1036 = vmatprep.mubr.f32.mxu1 %v352_v49 }
  0xb6   : > { %1013 = vmatmul.mubr.f32.gmra.mrb[12].mxu0 %v337_v50  ;;  %1037 = vmatmul.mubr.f32.gmra.mrb[12].mxu1 %v353_v51 }
  0xb7   : > { %1015 = vmatprep.mubr.f32.mxu0 %v338_v52  ;;  %1039 = vmatprep.mubr.f32.mxu1 %v354_v53 }
  0xba   : > { %1016 = vmatmul.mubr.f32.gmra.mrb[14].mxu0 %v339_v54  ;;  %1040 = vmatmul.mubr.f32.gmra.mrb[14].mxu1 %v355_v55 }
 0x171   : > { %v996_v57 = vpop.f32.mrb[0].mxu0  ;;  %v1020_v58 = vpop.f32.mrb[0].mxu1 }
 0x172   : > { %v704_v59 = vadd.f32 %v996_v57, %v1535_v56  ;;  %v720_v60 = vadd.f32 %v1020_v58, %v1535_v56  ;;  %v438_v61 = vpop.f32.mrb[1].mxu0  ;;  %v518_v62 = vpop.f32.mrb[1].mxu1 }
 0x173   : > { %v703_v63 = vadd.f32 %v1535_v56, %v438_v61  ;;  %v719_v0 = vadd.f32 %v1535_v56, %v518_v62 }
 0x174   : > { %736 = vst [vmem:[%s1541_s9 + $0x8] sm:$0xff] %v704_v59  ;;  %752 = vst [vmem:[%s1541_s9 + $0x88] sm:$0xff] %v720_v60 }
 0x175   : > { %735 = vst [vmem:[%s1541_s9] sm:$0xff] %v703_v63  ;;  %751 = vst [vmem:[%s1541_s9 + $0x80] sm:$0xff] %v719_v0  ;;  %v999_v1 = vpop.f32.mrb[2].mxu0  ;;  %v1023_v2 = vpop.f32.mrb[2].mxu1 }
 0x176   : > { %v706_v3 = vadd.f32 %v999_v1, %v1535_v56  ;;  %v722_v4 = vadd.f32 %v1023_v2, %v1535_v56  ;;  %v448_v5 = vpop.f32.mrb[3].mxu0  ;;  %v528_v6 = vpop.f32.mrb[3].mxu1 }
 0x177   : > { %v705_v7 = vadd.f32 %v1535_v56, %v448_v5  ;;  %v721_v8 = vadd.f32 %v1535_v56, %v528_v6 }
 0x178   : > { %738 = vst [vmem:[%s1541_s9 + $0x18] sm:$0xff] %v706_v3  ;;  %754 = vst [vmem:[%s1541_s9 + $0x98] sm:$0xff] %v722_v4 }
 0x179   : > { %737 = vst [vmem:[%s1541_s9 + $0x10] sm:$0xff] %v705_v7  ;;  %753 = vst [vmem:[%s1541_s9 + $0x90] sm:$0xff] %v721_v8  ;;  %v1002_v9 = vpop.f32.mrb[4].mxu0  ;;  %v1026_v10 = vpop.f32.mrb[4].mxu1 }
 0x17a   : > { %v708_v11 = vadd.f32 %v1002_v9, %v1535_v56  ;;  %v724_v12 = vadd.f32 %v1026_v10, %v1535_v56  ;;  %v458_v13 = vpop.f32.mrb[5].mxu0  ;;  %v538_v14 = vpop.f32.mrb[5].mxu1 }
 0x17b   : > { %v707_v15 = vadd.f32 %v1535_v56, %v458_v13  ;;  %v723_v16 = vadd.f32 %v1535_v56, %v538_v14 }
 0x17c   : > { %740 = vst [vmem:[%s1541_s9 + $0x28] sm:$0xff] %v708_v11  ;;  %756 = vst [vmem:[%s1541_s9 + $0xa8] sm:$0xff] %v724_v12 }
 0x17d   : > { %739 = vst [vmem:[%s1541_s9 + $0x20] sm:$0xff] %v707_v15  ;;  %755 = vst [vmem:[%s1541_s9 + $0xa0] sm:$0xff] %v723_v16  ;;  %v1005_v17 = vpop.f32.mrb[6].mxu0  ;;  %v1029_v18 = vpop.f32.mrb[6].mxu1 }
 0x17e   : > { %v710_v19 = vadd.f32 %v1005_v17, %v1535_v56  ;;  %v726_v20 = vadd.f32 %v1029_v18, %v1535_v56  ;;  %v468_v21 = vpop.f32.mrb[7].mxu0  ;;  %v548_v22 = vpop.f32.mrb[7].mxu1 }
 0x17f   : > { %v709_v23 = vadd.f32 %v1535_v56, %v468_v21  ;;  %v725_v24 = vadd.f32 %v1535_v56, %v548_v22 }
 0x180   : > { %742 = vst [vmem:[%s1541_s9 + $0x38] sm:$0xff] %v710_v19  ;;  %758 = vst [vmem:[%s1541_s9 + $0xb8] sm:$0xff] %v726_v20 }
 0x181   : > { %741 = vst [vmem:[%s1541_s9 + $0x30] sm:$0xff] %v709_v23  ;;  %757 = vst [vmem:[%s1541_s9 + $0xb0] sm:$0xff] %v725_v24  ;;  %v1008_v25 = vpop.f32.mrb[8].mxu0  ;;  %v1032_v26 = vpop.f32.mrb[8].mxu1 }
 0x182   : > { %v712_v27 = vadd.f32 %v1008_v25, %v1535_v56  ;;  %v728_v28 = vadd.f32 %v1032_v26, %v1535_v56  ;;  %v478_v29 = vpop.f32.mrb[9].mxu0  ;;  %v558_v30 = vpop.f32.mrb[9].mxu1 }
 0x183   : > { %v711_v31 = vadd.f32 %v1535_v56, %v478_v29  ;;  %v727_v32 = vadd.f32 %v1535_v56, %v558_v30 }
 0x184   : > { %744 = vst [vmem:[%s1541_s9 + $0x48] sm:$0xff] %v712_v27  ;;  %760 = vst [vmem:[%s1541_s9 + $0xc8] sm:$0xff] %v728_v28 }
 0x185   : > { %743 = vst [vmem:[%s1541_s9 + $0x40] sm:$0xff] %v711_v31  ;;  %759 = vst [vmem:[%s1541_s9 + $0xc0] sm:$0xff] %v727_v32  ;;  %v1011_v33 = vpop.f32.mrb[10].mxu0  ;;  %v1035_v34 = vpop.f32.mrb[10].mxu1 }
 0x186   : > { %v714_v35 = vadd.f32 %v1011_v33, %v1535_v56  ;;  %v730_v36 = vadd.f32 %v1035_v34, %v1535_v56  ;;  %v488_v37 = vpop.f32.mrb[11].mxu0  ;;  %v568_v38 = vpop.f32.mrb[11].mxu1 }
 0x187   : > { %v713_v39 = vadd.f32 %v1535_v56, %v488_v37  ;;  %v729_v40 = vadd.f32 %v1535_v56, %v568_v38 }
 0x188   : > { %746 = vst [vmem:[%s1541_s9 + $0x58] sm:$0xff] %v714_v35  ;;  %762 = vst [vmem:[%s1541_s9 + $0xd8] sm:$0xff] %v730_v36 }
 0x189   : > { %745 = vst [vmem:[%s1541_s9 + $0x50] sm:$0xff] %v713_v39  ;;  %761 = vst [vmem:[%s1541_s9 + $0xd0] sm:$0xff] %v729_v40  ;;  %v1014_v41 = vpop.f32.mrb[12].mxu0  ;;  %v1038_v42 = vpop.f32.mrb[12].mxu1 }
 0x18a   : > { %v716_v43 = vadd.f32 %v1014_v41, %v1535_v56  ;;  %v732_v44 = vadd.f32 %v1038_v42, %v1535_v56  ;;  %v498_v45 = vpop.f32.mrb[13].mxu0  ;;  %v578_v46 = vpop.f32.mrb[13].mxu1 }
 0x18b   : > { %v715_v47 = vadd.f32 %v1535_v56, %v498_v45  ;;  %v731_v48 = vadd.f32 %v1535_v56, %v578_v46 }
 0x18c   : > { %748 = vst [vmem:[%s1541_s9 + $0x68] sm:$0xff] %v716_v43  ;;  %764 = vst [vmem:[%s1541_s9 + $0xe8] sm:$0xff] %v732_v44 }
 0x18d   : > { %747 = vst [vmem:[%s1541_s9 + $0x60] sm:$0xff] %v715_v47  ;;  %763 = vst [vmem:[%s1541_s9 + $0xe0] sm:$0xff] %v731_v48  ;;  %v1017_v49 = vpop.f32.mrb[14].mxu0  ;;  %v1041_v50 = vpop.f32.mrb[14].mxu1 }
 0x18e   : > { %v718_v51 = vadd.f32 %v1017_v49, %v1535_v56  ;;  %v734_v52 = vadd.f32 %v1041_v50, %v1535_v56  ;;  %v508_v53 = vpop.f32.mrb[15].mxu0  ;;  %v588_v54 = vpop.f32.mrb[15].mxu1 }
 0x18f   : > { %v717_v55 = vadd.f32 %v1535_v56, %v508_v53  ;;  %v733_v57 = vadd.f32 %v1535_v56, %v588_v54 }
 0x190   : > { %750 = vst [vmem:[%s1541_s9 + $0x78] sm:$0xff] %v718_v51  ;;  %766 = vst [vmem:[%s1541_s9 + $0xf8] sm:$0xff] %v734_v52 }
 0x191   : > { %749 = vst [vmem:[%s1541_s9 + $0x70] sm:$0xff] %v717_v55  ;;  %765 = vst [vmem:[%s1541_s9 + $0xf0] sm:$0xff] %v733_v57 }
 0x192   : > { %1239 = shalt.err (!%p1236_p9)
}
 0x193   : > { %s1240_s7 = scalar_lea.hbm %s1600_s15, 4096  ;;  %s1244_s24 = scalar_lea.hbm %s1661_s3, 12288 }
 0x194   : > { %p1241_p1 = scmp.ne.s32.totalorder %s1600_s15, %s1240_s7  ;;  %p1245_p7 = scmp.lt.u32.totalorder %s1600_s15, %s1661_s3 }
 0x195   : > { %p1246_p13 = scmp.lt.u32.totalorder %s1244_s24, %s1240_s7  ;;  %p1248_p6 = scmp.lt.u32.totalorder %s1240_s7, %s1600_s15 }
 0x196   : > { %p1242_p2 = pnand %p1241_p1, %p1440_p11 }
 0x197   : > { %p1247_p4 = por %p1246_p13, %p1245_p7 }
 0x198   : > { %p1243_p3 = pneg %p1242_p2 }
 0x199   : > { %p1249_p8 = por %p1248_p6, %p1247_p4 }
 0x19b   : > { %p1250_p12 = pnand %p1249_p8, %p1243_p3 }
 0x19d   : > { %1253 = shalt.err (!%p1250_p12)
}
 0x19e   : > { %s1319_s9 = smov 128   ;;  %s1320_s18 = smov 384  }
 0x19f   : > { %s1321_s8 = smov 8  }
 0x1a0   : > { %1096 = dma.vmem_to_hbm [thread:$0]  (%p1440_p11), %s1604_s25, 4096, %s1600_s15, %s768_s21, %s1319_s9, %s1320_s18, %s1321_s8  }
 0x1a1 PF: > { %p1113_p10 = scmp.ge.s32.totalorder %s1312_s17, 2  ;;  %s798_s26 = sand.u32 1, %s1292_s12  }
 0x1a2   : > { %p1679_p0 = scmp.ne.s32.totalorder %s1669_s23, 0  ;;  %s799_s4 = scalar_lea.sflag [#allocation5], %s798_s26 }
 0x1a4   : > { %p1107_p5 = pnand %p1113_p10, %p1679_p0 }
 0x1a6   : > { %1287 = dma.done.wait (!%p1107_p5), %s799_s4, 4096  }
 0x1a7   : > { %1289 = vsyncadd (!%p1107_p5), %s799_s4, 4294963200  ;;  %s20_s17 = sadd.s32 1, %s1312_s17   ;;  %s1680_s12 = smov %s1296_s13 }
 0x1a8   : > { %p17_p9 = scmp.ge.s32.totalorder %s20_s17, 5   ;;  %s1681_s13 = smov %s1300_s14 }
 0x1a9   : > { %s1682_s14 = smov %s1449_s5  ;;  %s1683_s15 = smov %s1308_s16 }
 0x1aa   : > { %s1684_s16 = smov %s1686_s28  ;;  %19 = sbr.rel (!%p17_p9) target bundleno = 7 (0x7), region = 94 }
 0x1b1   :  { %804 = vsyncpa [#allocation4], 1 }
 0x1b2   :  { %806 = vsyncpa [#allocation4 + $0x1], 1 }
 0x1b3   :  { %807 = vsyncpa [#allocation7], 1 }
 0x1b4   :  { %809 = vsyncpa [#allocation7 + $0x1], 1 }
 0x1b5   :  { %810 = vsyncpa [#allocation5], 1 }
 0x1b6   :  { %812 = vsyncpa [#allocation5 + $0x1], 1 }

</bundles_post_ra>
